<compile_context>
chip_gen: v6e
topology: v6e:2x2x1
jax: 0.10.0
libtpu: 0.0.40
codegen_flags: <defaults>
</compile_context>

<pallas_src>
import math

import jax
import jax.numpy as jnp
import numpy as np
from jax.experimental import pallas as pl
from jax.experimental.pallas import tpu as pltpu

# ---- config (the "args" of VAE_DELTA) --------------------------------------
BATCH = 8                      # = f32 sublane count, no masked-sublane handling
NUM_INTERM_POINTS = 8
CONDITION_DIM = 2
HIDDEN = 32
LATENT = 8

P = NUM_INTERM_POINTS
XDIM = 2 * (P + 2)             # flattened trajectory width           (= 20)
DDIM = 2 * P                   # flattened delta width                (= 16)
HEAD = 2 * LATENT              # fused [mu | log_sigma2] width        (= 16)
OUT_W = XDIM + HEAD            # fused kernel output width            (= 36)
IN_W = XDIM + LATENT           # fused kernel input width  [x | eps]  (= 28)

# ---- single weight-slab layout (all row offsets are multiples of 8) --------
R_X = 0          # rows   0: 20  x-side weights [enc1-cond | dec1-cond | placement]
R_DELTA = 24     # rows  24: 40  encoder_1 delta rows
R_ENC2 = 48      # rows  48: 80  encoder_2
R_HEAD = 80      # rows  80:112  fused [mu | log_sigma2] head
R_DEC2 = 112     # rows 112:144  decoder_2
R_DEC3 = 144     # rows 144:176  decoder_3 (prefix-sum folded)
R_DEC1Z = 176    # rows 176:184  decoder_1 (z part)
R_BIAS = 184     # rows 184:192  biases (one per row)
N_ROWS = 192
N_COLS = 2 * HIDDEN + XDIM     # 84


# ---- Pallas kernel: feature-extract -> encode -> sample -> decode -> cumsum
def _vae_fused_kernel(xin_ref, w_ref, out_ref):
    xin = xin_ref[...]                                     # (B, 28)
    x = xin[:, 0:XDIM]                                     # (B, 20)
    eps = xin[:, XDIM:IN_W]                                # (B, 8)
    # exact neighbor-point differences on the VALU (avoids the f32 cancellation
    # of folding the subtraction into the MXU accumulation)
    delta = xin[:, 2:2 + DDIM] - xin[:, 0:DDIM]            # (B, 16)

    bias = w_ref[R_BIAS:R_BIAS + 8, 0:HIDDEN]              # (8, 32)

    # one MXU push: enc1 conditioning, dec1 conditioning, start/goal placement
    xw = jnp.dot(x, w_ref[R_X:R_X + XDIM, :],
                 preferred_element_type=jnp.float32)       # (B, 84)

    # encoder
    h = jnp.tanh(jnp.dot(delta, w_ref[R_DELTA:R_DELTA + DDIM, 0:HIDDEN],
                         preferred_element_type=jnp.float32)
                 + xw[:, 0:HIDDEN] + bias[0:1, :])
    h = jnp.tanh(jnp.dot(h, w_ref[R_ENC2:R_ENC2 + HIDDEN, 0:HIDDEN],
                         preferred_element_type=jnp.float32) + bias[1:2, :])
    # fused [mu | log_sigma2] head
    head = (jnp.dot(h, w_ref[R_HEAD:R_HEAD + HIDDEN, 0:HEAD],
                    preferred_element_type=jnp.float32) + bias[2:3, 0:HEAD])  # (B, 16)
    # store the head immediately: its writeback overlaps the decoder chain
    out_ref[:, XDIM:OUT_W] = head

    # reparameterization: z = mu + eps * exp(0.5 * log_sigma2)
    z = head[:, 0:LATENT] + eps * jnp.exp(0.5 * head[:, LATENT:HEAD])

    # decoder (start/goal conditioning arrives pre-folded through xw[:, 32:64])
    h1 = jnp.tanh(jnp.dot(z, w_ref[R_DEC1Z:R_DEC1Z + LATENT, 0:HIDDEN],
                          preferred_element_type=jnp.float32)
                  + xw[:, HIDDEN:2 * HIDDEN] + bias[3:4, :])
    h1 = jnp.tanh(jnp.dot(h1, w_ref[R_DEC2:R_DEC2 + HIDDEN, 0:HIDDEN],
                          preferred_element_type=jnp.float32) + bias[4:5, :])
    # decoder_3 folded with the prefix-sum matrix; xw[:, 64:84] places start/goal,
    # so `res` is already the final flattened trajectory (cumsum applied).
    res = (jnp.dot(h1, w_ref[R_DEC3:R_DEC3 + HIDDEN, 0:XDIM],
                   preferred_element_type=jnp.float32)
           + xw[:, 2 * HIDDEN:2 * HIDDEN + XDIM] + bias[5:6, 0:XDIM])          # (B, 20)
    out_ref[:, 0:XDIM] = res


# ---- parameter init (deterministic, mimics nn.Linear uniform init) ---------
def _init_linear(key, fan_in, fan_out):
    kw, kb = jax.random.split(key)
    bound = 1.0 / math.sqrt(fan_in)
    w = jax.random.uniform(kw, (fan_in, fan_out), jnp.float32, -bound, bound)
    b = jax.random.uniform(kb, (1, fan_out), jnp.float32, -bound, bound)
    return w, b


def init_params(key):
    keys = jax.random.split(key, 7)
    p = {}
    p["enc1_w"], p["enc1_b"] = _init_linear(keys[0], DDIM + 2 * CONDITION_DIM, HIDDEN)
    p["enc2_w"], p["enc2_b"] = _init_linear(keys[1], HIDDEN, HIDDEN)
    p["mu_w"], p["mu_b"] = _init_linear(keys[2], HIDDEN, LATENT)
    p["ls_w"], p["ls_b"] = _init_linear(keys[3], HIDDEN, LATENT)
    p["dec1_w"], p["dec1_b"] = _init_linear(keys[4], LATENT + 2 * CONDITION_DIM, HIDDEN)
    p["dec2_w"], p["dec2_b"] = _init_linear(keys[5], HIDDEN, HIDDEN)
    p["dec3_w"], p["dec3_b"] = _init_linear(keys[6], HIDDEN, DDIM)
    return p


# ---- one-time packing of all parameters into ONE (192, 84) slab ------------
def pack_params(p):
    enc1_w = np.asarray(p["enc1_w"]); enc1_b = np.asarray(p["enc1_b"])
    enc2_w = np.asarray(p["enc2_w"]); enc2_b = np.asarray(p["enc2_b"])
    mu_w = np.asarray(p["mu_w"]);     mu_b = np.asarray(p["mu_b"])
    ls_w = np.asarray(p["ls_w"]);     ls_b = np.asarray(p["ls_b"])
    dec1_w = np.asarray(p["dec1_w"]); dec1_b = np.asarray(p["dec1_b"])
    dec2_w = np.asarray(p["dec2_w"]); dec2_b = np.asarray(p["dec2_b"])
    dec3_w = np.asarray(p["dec3_w"]); dec3_b = np.asarray(p["dec3_b"])

    slab = np.zeros((N_ROWS, N_COLS), np.float32)

    # --- x-side weights (rows 0:20), multiplied by raw x_flat ---------------
    # cols 0:32   encoder_1 start/goal conditioning rows
    slab[R_X + 0:R_X + 2, 0:HIDDEN] = enc1_w[DDIM:DDIM + 2, :]                 # start
    slab[R_X + XDIM - 2:R_X + XDIM, 0:HIDDEN] = enc1_w[DDIM + 2:DDIM + 4, :]   # goal
    # cols 32:64  decoder_1 start/goal conditioning rows
    slab[R_X + 0:R_X + 2, HIDDEN:2 * HIDDEN] = dec1_w[LATENT:LATENT + 2, :]
    slab[R_X + XDIM - 2:R_X + XDIM, HIDDEN:2 * HIDDEN] = dec1_w[LATENT + 2:LATENT + 4, :]
    # cols 64:84  placement: start into points 0..P (cumsum base), goal into point P+1
    for j in range(P + 1):
        slab[R_X + 0, 2 * HIDDEN + 2 * j] = 1.0
        slab[R_X + 1, 2 * HIDDEN + 2 * j + 1] = 1.0
    slab[R_X + XDIM - 2, 2 * HIDDEN + XDIM - 2] = 1.0
    slab[R_X + XDIM - 1, 2 * HIDDEN + XDIM - 1] = 1.0

    # --- encoder_1 delta rows (multiplied by the exact in-kernel delta) -----
    slab[R_DELTA:R_DELTA + DDIM, 0:HIDDEN] = enc1_w[0:DDIM, :]

    # --- hidden-side weights -------------------------------------------------
    slab[R_ENC2:R_ENC2 + HIDDEN, 0:HIDDEN] = enc2_w
    slab[R_HEAD:R_HEAD + HIDDEN, 0:LATENT] = mu_w
    slab[R_HEAD:R_HEAD + HIDDEN, LATENT:HEAD] = ls_w
    slab[R_DEC2:R_DEC2 + HIDDEN, 0:HIDDEN] = dec2_w

    # decoder_3 folded with "result[:, idx] += result[:, idx-1]" prefix-sum matrix
    bmat = np.zeros((DDIM, XDIM), np.float32)
    for i in range(P):
        for j in range(i + 1, P + 1):
            bmat[2 * i, 2 * j] = 1.0
            bmat[2 * i + 1, 2 * j + 1] = 1.0
    slab[R_DEC3:R_DEC3 + HIDDEN, 0:XDIM] = dec3_w @ bmat
    slab[R_DEC1Z:R_DEC1Z + LATENT, 0:HIDDEN] = dec1_w[0:LATENT, :]

    # --- biases (one per row) ------------------------------------------------
    slab[R_BIAS + 0, 0:HIDDEN] = enc1_b[0]
    slab[R_BIAS + 1, 0:HIDDEN] = enc2_b[0]
    slab[R_BIAS + 2, 0:LATENT] = mu_b[0]
    slab[R_BIAS + 2, LATENT:HEAD] = ls_b[0]
    slab[R_BIAS + 3, 0:HIDDEN] = dec1_b[0]
    slab[R_BIAS + 4, 0:HIDDEN] = dec2_b[0]
    slab[R_BIAS + 5, 0:XDIM] = (dec3_b @ bmat)[0]

    return jnp.asarray(slab)


# ---- wrapper: one pallas_call (2 operands, 1 output), cheap slices after ----
def vae_delta_forward(x, w_slab, eps):
    b = x.shape[0]
    xin = jnp.concatenate([x.reshape(b, XDIM), eps], axis=1)     # (B, 28), one DMA

    vmem = pl.BlockSpec(memory_space=pltpu.MemorySpace.VMEM)
    out = pl.pallas_call(
        _vae_fused_kernel,
        out_shape=jax.ShapeDtypeStruct((b, OUT_W), jnp.float32),
        in_specs=[vmem, vmem],
        out_specs=vmem,
    )(xin, w_slab)

    result = out[:, :XDIM].reshape(b, P + 2, 2)
    z_mu = out[:, XDIM:XDIM + LATENT]
    z_log_sigma2 = out[:, XDIM + LATENT:OUT_W]
    return result, z_mu, z_log_sigma2


# ---- pure-JAX reference (mirrors the PyTorch forward, raw weights) ----------
def _reference_forward(x, p, eps):
    b = x.shape[0]
    start = x[:, 0, :].reshape(b, 2)
    goal = x[:, -1, :].reshape(b, 2)
    delta = (x[:, 1:-1, :] - x[:, :-2, :]).reshape(b, DDIM)
    x_cat = jnp.concatenate([delta, start, goal], axis=1)
    h = jnp.tanh(x_cat @ p["enc1_w"] + p["enc1_b"])
    h = jnp.tanh(h @ p["enc2_w"] + p["enc2_b"])
    mu = h @ p["mu_w"] + p["mu_b"]
    ls = h @ p["ls_w"] + p["ls_b"]
    z = mu + eps * jnp.exp(0.5 * ls)
    z_cat = jnp.concatenate([z, start, goal], axis=1)
    h1 = jnp.tanh(z_cat @ p["dec1_w"] + p["dec1_b"])
    h1 = jnp.tanh(h1 @ p["dec2_w"] + p["dec2_b"])
    dec = h1 @ p["dec3_w"] + p["dec3_b"]
    result = np.concatenate(
        [np.asarray(start)[:, None, :],
         np.asarray(dec).reshape(b, P, 2),
         np.asarray(goal)[:, None, :]], axis=1)
    for idx in range(1, P + 1):               # sequential cumsum, as in the module
        result[:, idx, :] += result[:, idx - 1, :]
    return jnp.asarray(result), mu, ls


if __name__ == "__main__":
    key = jax.random.PRNGKey(0)
    k_x, k_eps, k_p = jax.random.split(key, 3)

    # trajectory input: (batch, num_interm_points + 2, 2), pixel-scale coords
    x = jax.random.uniform(k_x, (BATCH, P + 2, 2), jnp.float32, 0.0, 1080.0)
    # deterministic "randn_like" epsilon for the reparameterization trick
    eps = jax.random.normal(k_eps, (BATCH, LATENT), jnp.float32)

    params = init_params(k_p)
    w_slab = pack_params(params)

    fwd = jax.jit(vae_delta_forward)
    result, z_mu, z_log_sigma2 = fwd(x, w_slab, eps)
    jax.block_until_ready((result, z_mu, z_log_sigma2))

    ref_result, ref_mu, ref_ls = _reference_forward(x, params, eps)
    np.testing.assert_allclose(np.array(result), np.array(ref_result),
                               rtol=2e-4, atol=2e-3)
    np.testing.assert_allclose(np.array(z_mu), np.array(ref_mu),
                               rtol=2e-4, atol=1e-3)
    np.testing.assert_allclose(np.array(z_log_sigma2), np.array(ref_ls),
                               rtol=2e-4, atol=1e-3)

    print("KERNEL_OK")
</pallas_src>

<mosaic_0001>
module attributes {stable_mosaic.version = 11 : i64} {
  func.func @_vae_fused_kernel(%arg0: memref<8x28xf32, #tpu.memory_space<vmem>>, %arg1: memref<192x84xf32, #tpu.memory_space<vmem>>, %arg2: memref<8x36xf32, #tpu.memory_space<vmem>>) attributes {dimension_semantics = [], scalar_prefetch = 0 : i64, scratch_operands = 0 : i64, tpu.core_type = #tpu.core_type<tc>} {
    %c0 = arith.constant 0 : index
    %c0_0 = arith.constant 0 : index
    %0 = vector.load %arg0[%c0, %c0_0] : memref<8x28xf32, #tpu.memory_space<vmem>>, vector<8x28xf32>
    %1 = vector.extract_strided_slice %0 {offsets = [0, 0], sizes = [8, 20], strides = [1, 1]} : vector<8x28xf32> to vector<8x20xf32>
    %2 = vector.extract_strided_slice %0 {offsets = [0, 20], sizes = [8, 8], strides = [1, 1]} : vector<8x28xf32> to vector<8x8xf32>
    %3 = vector.extract_strided_slice %0 {offsets = [0, 2], sizes = [8, 16], strides = [1, 1]} : vector<8x28xf32> to vector<8x16xf32>
    %4 = vector.extract_strided_slice %0 {offsets = [0, 0], sizes = [8, 16], strides = [1, 1]} : vector<8x28xf32> to vector<8x16xf32>
    %5 = arith.subf %3, %4 : vector<8x16xf32>
    %c184 = arith.constant 184 : index
    %c0_1 = arith.constant 0 : index
    %6 = vector.load %arg1[%c184, %c0_1] : memref<192x84xf32, #tpu.memory_space<vmem>>, vector<8x32xf32>
    %c0_2 = arith.constant 0 : index
    %c0_3 = arith.constant 0 : index
    %7 = vector.load %arg1[%c0_2, %c0_3] : memref<192x84xf32, #tpu.memory_space<vmem>>, vector<20x84xf32>
    %cst = arith.constant dense<0.000000e+00> : vector<8x84xf32>
    %8 = tpu.matmul %1, %7, %cst {dimension_numbers = #tpu.dot_dimension_numbers<[1], [0], [0], [1], [0, 0, 1, 1], [], []>} : vector<8x20xf32>, vector<20x84xf32>, vector<8x84xf32> -> vector<8x84xf32>
    %c24 = arith.constant 24 : index
    %c0_4 = arith.constant 0 : index
    %9 = vector.load %arg1[%c24, %c0_4] : memref<192x84xf32, #tpu.memory_space<vmem>>, vector<16x32xf32>
    %cst_5 = arith.constant dense<0.000000e+00> : vector<8x32xf32>
    %10 = tpu.matmul %5, %9, %cst_5 {dimension_numbers = #tpu.dot_dimension_numbers<[1], [0], [0], [1], [0, 0, 1, 1], [], []>} : vector<8x16xf32>, vector<16x32xf32>, vector<8x32xf32> -> vector<8x32xf32>
    %11 = vector.extract_strided_slice %8 {offsets = [0, 0], sizes = [8, 32], strides = [1, 1]} : vector<8x84xf32> to vector<8x32xf32>
    %12 = arith.addf %10, %11 : vector<8x32xf32>
    %13 = vector.extract_strided_slice %6 {offsets = [0, 0], sizes = [1, 32], strides = [1, 1]} : vector<8x32xf32> to vector<1x32xf32>
    %14 = vector.broadcast %13 : vector<1x32xf32> to vector<8x32xf32>
    %15 = arith.addf %12, %14 : vector<8x32xf32>
    %16 = math.tanh %15 : vector<8x32xf32>
    %c48 = arith.constant 48 : index
    %c0_6 = arith.constant 0 : index
    %17 = vector.load %arg1[%c48, %c0_6] : memref<192x84xf32, #tpu.memory_space<vmem>>, vector<32x32xf32>
    %cst_7 = arith.constant dense<0.000000e+00> : vector<8x32xf32>
    %18 = tpu.matmul %16, %17, %cst_7 {dimension_numbers = #tpu.dot_dimension_numbers<[1], [0], [0], [1], [0, 0, 1, 1], [], []>} : vector<8x32xf32>, vector<32x32xf32>, vector<8x32xf32> -> vector<8x32xf32>
    %19 = vector.extract_strided_slice %6 {offsets = [1, 0], sizes = [1, 32], strides = [1, 1]} : vector<8x32xf32> to vector<1x32xf32>
    %20 = vector.broadcast %19 : vector<1x32xf32> to vector<8x32xf32>
    %21 = arith.addf %18, %20 : vector<8x32xf32>
    %22 = math.tanh %21 : vector<8x32xf32>
    %c80 = arith.constant 80 : index
    %c0_8 = arith.constant 0 : index
    %23 = vector.load %arg1[%c80, %c0_8] : memref<192x84xf32, #tpu.memory_space<vmem>>, vector<32x16xf32>
    %cst_9 = arith.constant dense<0.000000e+00> : vector<8x16xf32>
    %24 = tpu.matmul %22, %23, %cst_9 {dimension_numbers = #tpu.dot_dimension_numbers<[1], [0], [0], [1], [0, 0, 1, 1], [], []>} : vector<8x32xf32>, vector<32x16xf32>, vector<8x16xf32> -> vector<8x16xf32>
    %25 = vector.extract_strided_slice %6 {offsets = [2, 0], sizes = [1, 16], strides = [1, 1]} : vector<8x32xf32> to vector<1x16xf32>
    %26 = vector.broadcast %25 : vector<1x16xf32> to vector<8x16xf32>
    %27 = arith.addf %24, %26 : vector<8x16xf32>
    %c0_10 = arith.constant 0 : index
    %c20 = arith.constant 20 : index
    %28 = vector.load %arg2[%c0_10, %c20] : memref<8x36xf32, #tpu.memory_space<vmem>>, vector<8x16xf32>
    tpu.vector_store %arg2[%c0_10, %c20], %27 {strides = array<i32>} : memref<8x36xf32, #tpu.memory_space<vmem>>, vector<8x16xf32>,
    %29 = vector.extract_strided_slice %27 {offsets = [0, 0], sizes = [8, 8], strides = [1, 1]} : vector<8x16xf32> to vector<8x8xf32>
    %30 = vector.extract_strided_slice %27 {offsets = [0, 8], sizes = [8, 8], strides = [1, 1]} : vector<8x16xf32> to vector<8x8xf32>
    %cst_11 = arith.constant 5.000000e-01 : f32
    %31 = vector.broadcast %cst_11 : f32 to vector<8x8xf32>
    %32 = arith.mulf %31, %30 : vector<8x8xf32>
    %33 = math.exp %32 : vector<8x8xf32>
    %34 = arith.mulf %2, %33 : vector<8x8xf32>
    %35 = arith.addf %29, %34 : vector<8x8xf32>
    %c176 = arith.constant 176 : index
    %c0_12 = arith.constant 0 : index
    %36 = vector.load %arg1[%c176, %c0_12] : memref<192x84xf32, #tpu.memory_space<vmem>>, vector<8x32xf32>
    %cst_13 = arith.constant dense<0.000000e+00> : vector<8x32xf32>
    %37 = tpu.matmul %35, %36, %cst_13 {dimension_numbers = #tpu.dot_dimension_numbers<[1], [0], [0], [1], [0, 0, 1, 1], [], []>} : vector<8x8xf32>, vector<8x32xf32>, vector<8x32xf32> -> vector<8x32xf32>
    %38 = vector.extract_strided_slice %8 {offsets = [0, 32], sizes = [8, 32], strides = [1, 1]} : vector<8x84xf32> to vector<8x32xf32>
    %39 = arith.addf %37, %38 : vector<8x32xf32>
    %40 = vector.extract_strided_slice %6 {offsets = [3, 0], sizes = [1, 32], strides = [1, 1]} : vector<8x32xf32> to vector<1x32xf32>
    %41 = vector.broadcast %40 : vector<1x32xf32> to vector<8x32xf32>
    %42 = arith.addf %39, %41 : vector<8x32xf32>
    %43 = math.tanh %42 : vector<8x32xf32>
    %c112 = arith.constant 112 : index
    %c0_14 = arith.constant 0 : index
    %44 = vector.load %arg1[%c112, %c0_14] : memref<192x84xf32, #tpu.memory_space<vmem>>, vector<32x32xf32>
    %cst_15 = arith.constant dense<0.000000e+00> : vector<8x32xf32>
    %45 = tpu.matmul %43, %44, %cst_15 {dimension_numbers = #tpu.dot_dimension_numbers<[1], [0], [0], [1], [0, 0, 1, 1], [], []>} : vector<8x32xf32>, vector<32x32xf32>, vector<8x32xf32> -> vector<8x32xf32>
    %46 = vector.extract_strided_slice %6 {offsets = [4, 0], sizes = [1, 32], strides = [1, 1]} : vector<8x32xf32> to vector<1x32xf32>
    %47 = vector.broadcast %46 : vector<1x32xf32> to vector<8x32xf32>
    %48 = arith.addf %45, %47 : vector<8x32xf32>
    %49 = math.tanh %48 : vector<8x32xf32>
    %c144 = arith.constant 144 : index
    %c0_16 = arith.constant 0 : index
    %50 = vector.load %arg1[%c144, %c0_16] : memref<192x84xf32, #tpu.memory_space<vmem>>, vector<32x20xf32>
    %cst_17 = arith.constant dense<0.000000e+00> : vector<8x20xf32>
    %51 = tpu.matmul %49, %50, %cst_17 {dimension_numbers = #tpu.dot_dimension_numbers<[1], [0], [0], [1], [0, 0, 1, 1], [], []>} : vector<8x32xf32>, vector<32x20xf32>, vector<8x20xf32> -> vector<8x20xf32>
    %52 = vector.extract_strided_slice %8 {offsets = [0, 64], sizes = [8, 20], strides = [1, 1]} : vector<8x84xf32> to vector<8x20xf32>
    %53 = arith.addf %51, %52 : vector<8x20xf32>
    %54 = vector.extract_strided_slice %6 {offsets = [5, 0], sizes = [1, 20], strides = [1, 1]} : vector<8x32xf32> to vector<1x20xf32>
    %55 = vector.broadcast %54 : vector<1x20xf32> to vector<8x20xf32>
    %56 = arith.addf %53, %55 : vector<8x20xf32>
    %c0_18 = arith.constant 0 : index
    %c0_19 = arith.constant 0 : index
    %57 = vector.load %arg2[%c0_18, %c0_19] : memref<8x36xf32, #tpu.memory_space<vmem>>, vector<8x20xf32>
    tpu.vector_store %arg2[%c0_18, %c0_19], %56 {strides = array<i32>} : memref<8x36xf32, #tpu.memory_space<vmem>>, vector<8x20xf32>,
    return
  }
}

</mosaic_0001>

<bundles_post_ra>
// kernel: vae_delta_forward.1
= control target key start
LH: loop header
LB: loop body
LE: loop exit
PB: predicated region body
PF: predicated region fallthrough
CT: control target
= control target key end

     0   :  { %vm24_vm0 = vcmask 1043456   ;;  %v743_v1 = vmov 0.0   ;;  %s744_s15 = smov 2   ;;  %vm745_vm1 = vmmov 0   ;;  %vm21_vm2 = vcmask 162816   ;;  %s746_s21 = smov 126   ;;  %s914_s0 = inlined_call_operand.vmem [shape: f32[8,28], index: 0, kind: input, shape index: {}]   ;;  %s915_s1 = inlined_call_operand.vmem [shape: f32[192,84], index: 1, kind: input, shape index: {}]   ;;  %s916_s2 = inlined_call_operand.vmem [shape: f32[8,36], index: 2, kind: output, shape index: {}]  }
   0x1   :  { %v770_v0 = vld [vmem:[%s914_s0] sm:$0xff]  ;;  %659 = vmatprep.subr.mxu0 %v743_v1  ;;  %v20_v2 = vld [vmem:[%s915_s1 + $0x10] sm:$0xf]  ;;  %v19_v3 = vld [vmem:[%s915_s1 + $0x8] sm:$0xff]  ;;  %668 = vmatprep.subr.mxu1 %v743_v1  ;;  %vm103_vm3 = vcmask 130048   ;;  %s747_s22 = smov 96   ;;  %v176_v16 = vlaneseq }
   0x2   :  { %13 = vrot.lane.b32.xlu0 %v770_v0, %s744_s15  ;;  %660 = vmatpush3.msk.msra.mxu0 %vm24_vm0, %v20_v2  ;;  %v99_v4 = vld [vmem:[%s915_s1 + $0x20] sm:$0xff]  ;;  %v98_v6 = vld [vmem:[%s915_s1 + $0x18] sm:$0xff]  ;;  %v185_v12 = vld [vmem:[%s915_s1 + $0x48] sm:$0xff]  ;;  %vm190_vm4 = vcmask 261120   ;;  %s748_s13 = smov 20   ;;  %s749_s16 = smov 12  }
   0x3   :  { %661 = vmatprep.subr.mxu0 %v743_v1  ;;  %v18_v5 = vld [vmem:[%s915_s1] sm:$0xff]  ;;  %665 = vmatprep.mubr.msk.f32.mxu0 %vm745_vm1, %v743_v1  ;;  %v183_v14 = vld [vmem:[%s915_s1 + $0x38] sm:$0xff]  ;;  %v182_v15 = vld [vmem:[%s915_s1 + $0x30] sm:$0xff]  ;;  %v825_v17 = vshrl.u32 %v176_v16, 7  ;;  %vm350_vm5 = vcmask 294048   ;;  %s750_s18 = smov 108  }
   0x4   :  { %662 = vmatpush3.msra.mxu0 %v19_v3  ;;  %669 = vmatpush3.msra.mxu1 %v99_v4  ;;  %v184_v13 = vld [vmem:[%s915_s1 + $0x40] sm:$0xff]  ;;  %v831_v19 = vld [vmem:[%s915_s1 + $0xb8] sm:$0xff]  ;;  %v268_v26 = vld [vmem:[%s915_s1 + $0x68] sm:$0xff]  ;;  %s751_s19 = smov 64   ;;  %vm370_vm6 = vcmask 64512  }
   0x5   :  { %663 = vmatprep.subr.mxu0 %v743_v1  ;;  %670 = vmatprep.subr.mxu1 %v743_v1  ;;  %v178_v18 = vsub.s32 0, %v825_v17  ;;  %v267_v27 = vld [vmem:[%s915_s1 + $0x60] sm:$0xff]  ;;  %v266_v28 = vld [vmem:[%s915_s1 + $0x58] sm:$0xff]  ;;  %v265_v29 = vld [vmem:[%s915_s1 + $0x50] sm:$0xff]  ;;  %v188_v30 = vsub.s32 1, %v825_v17  ;;  %v271_v36 = vsub.s32 2, %v825_v17 }
   0x6   :  { %664 = vmatpush3.msra.mxu0 %v18_v5  ;;  %671 = vmatpush3.msra.mxu1 %v98_v6  ;;  %v365_v43 = vld [vmem:[%s915_s1 + $0xb0] sm:$0xff]  ;;  %v453_v51 = vld [vmem:[%s915_s1 + $0x88] sm:$0xff]  ;;  %v452_v52 = vld [vmem:[%s915_s1 + $0x80] sm:$0xff]  ;;  %v446_v55 = vsub.s32 3, %v825_v17  ;;  %v456_v3 = vsub.s32 4, %v825_v17 }
   0x7   :  { %666 = vmatmul.mubr.msk.f32.vlgmr.msra.gmra.mxu0 %vm21_vm2, %v770_v0  ;;  %672 = vmatprep.mubr.msk.f32.mxu1 %vm745_vm1, %v743_v1  ;;  %v179_v20 = vrot.slane %v831_v19, %v178_v18  ;;  %v189_v31 = vrot.slane %v831_v19, %v188_v30  ;;  %v272_v37 = vrot.slane %v831_v19, %v271_v36  ;;  %v451_v53 = vld [vmem:[%s915_s1 + $0x78] sm:$0xff]  ;;  %v450_v54 = vld [vmem:[%s915_s1 + $0x70] sm:$0xff]  ;;  %v535_v62 = vld [vmem:[%s915_s1 + $0xa8] sm:$0xff] }
   0x8   :  { %675 = vmatprep.subr.mxu1 %v743_v1  ;;  %686 = vmatprep.subr.mxu0 %v743_v1  ;;  %v447_v56 = vrot.slane %v831_v19, %v446_v55  ;;  %v534_v63 = vld [vmem:[%s915_s1 + $0xa0] sm:$0xff]  ;;  %v532_v2 = vld [vmem:[%s915_s1 + $0x90] sm:$0xff]  ;;  %v457_v4 = vrot.slane %v831_v19, %v456_v3 }
   0x9   :  { %694 = vmatprep.mubr.msk.f32.mxu0 %vm745_vm1, %v743_v1  ;;  %687 = vmatpush3.msra.mxu0 %v268_v26 }
   0xa   :  { %688 = vmatprep.subr.mxu0 %v743_v1 }
   0xb   :  { %689 = vmatpush3.msra.mxu0 %v267_v27 }
   0xc   :  { %690 = vmatprep.subr.mxu0 %v743_v1 }
   0xd   :  { %691 = vmatpush3.msra.mxu0 %v266_v28 }
   0xe   :  { %692 = vmatprep.subr.mxu0 %v743_v1 }
   0xf   :  { %693 = vmatpush3.msra.mxu0 %v265_v29 }
  0x10   :  { %702 = vmatprep.subr.mxu0 %v743_v1 }
  0x74   :  { %v14_v7 = vpop.permute.xlu0 %13 }
  0x75   :  { %v16_v8 = vsub.f32 %v770_v0, %v14_v7 }
  0x77   :  { %101 = vrot.lane.b32.xlu0 %v16_v8, %s746_s21 }
  0xc7   :  { %v804_v9 = vpop.f32.mrf.mxu0 }
  0xc8   :  { %367 = vrot.lane.b32.xlu0 %v804_v9, %s747_s22 }
  0xc9   :  { %v667_v10 = vpop.f32.mrf.mxu0 }
  0xe9   :  { %v102_v11 = vpop.permute.xlu0 %101 }
  0xea   :  { %673 = vmatmul.mubr.msk.f32.vlgmr.msra.gmra.mxu1 %vm103_vm3, %v102_v11 }
  0xeb   :  { %683 = vmatprep.mubr.msk.f32.mxu1 %vm745_vm1, %v743_v1  ;;  %676 = vmatpush3.msra.mxu1 %v185_v12 }
  0xec   :  { %677 = vmatprep.subr.mxu1 %v743_v1 }
  0xed   :  { %678 = vmatpush3.msra.mxu1 %v184_v13 }
  0xee   :  { %679 = vmatprep.subr.mxu1 %v743_v1 }
  0xef   :  { %680 = vmatpush3.msra.mxu1 %v183_v14 }
  0xf0   :  { %681 = vmatprep.subr.mxu1 %v743_v1 }
  0xf1   :  { %682 = vmatpush3.msra.mxu1 %v182_v15 }
  0xf2   :  { %697 = vmatprep.subr.mxu1 %v743_v1 }
 0x13a   :  { %v368_v45 = vpop.permute.xlu0 %367 }
 0x1aa   :  { %v172_v21 = vpop.f32.mrf.mxu1 }
 0x1ab   :  { %v173_v22 = vadd.f32 %v172_v21, %v804_v9 }
 0x1ac   :  { %v674_v23 = vpop.f32.mrf.mxu1 }
 0x1ad   :  { %v180_v24 = vadd.f32 %v179_v20, %v173_v22 }
 0x1af   :  { %733 = vtanh.f32 %v180_v24 }
 0x1bc   :  { %v734_v25 = vpop.eup %733 }
 0x1bd   :  { %684 = vmatmul.mubr.msk.f32.vlgmr.msra.gmra.mxu1 %vm190_vm4, %v734_v25 }
 0x1be   :  { %699 = vmatprep.mubr.msk.f32.mxu1 %vm745_vm1, %v743_v1  ;;  %698 = vmatpush3.msra.mxu1 %v365_v43 }
 0x1bf   :  { %713 = vmatprep.subr.mxu1 %v743_v1 }
 0x27d   :  { %v260_v32 = vpop.f32.mrf.mxu1 }
 0x27e   :  { %v261_v33 = vadd.f32 %v260_v32, %v189_v31 }
 0x27f   :  { %v685_v34 = vpop.f32.mrf.mxu1 }
 0x280   :  { %735 = vtanh.f32 %v261_v33 }
 0x28d   :  { %v736_v35 = vpop.eup %735 }
 0x28e   :  { %695 = vmatmul.mubr.msk.f32.vlgmr.msra.gmra.mxu0 %vm190_vm4, %v736_v35 }
 0x28f   :  { %710 = vmatprep.mubr.msk.f32.mxu0 %vm745_vm1, %v743_v1  ;;  %703 = vmatpush3.msra.mxu0 %v453_v51 }
 0x290   :  { %704 = vmatprep.subr.mxu0 %v743_v1 }
 0x291   :  { %705 = vmatpush3.msra.mxu0 %v452_v52 }
 0x292   :  { %706 = vmatprep.subr.mxu0 %v743_v1 }
 0x293   :  { %707 = vmatpush3.msra.mxu0 %v451_v53 }
 0x294   :  { %708 = vmatprep.subr.mxu0 %v743_v1 }
 0x295   :  { %709 = vmatpush3.msra.mxu0 %v450_v54 }
 0x34e   :  { %v342_v38 = vpop.f32.mrf.mxu0 }
 0x34f   :  { %v343_v39 = vadd.f32 %v342_v38, %v272_v37 }
 0x350   :  { %v696_v40 = vpop.f32.mrf.mxu0 }
 0x351   :  { %v352_v41 = vmul.f32 0.5, %v343_v39  ;;  %347 = vrot.lane.b32.xlu0 %v343_v39, %s748_s13 }
 0x353   :  { %v353_v42 = vmul.f32 1.442695, %v352_v41 }
 0x355   :  { %737 = vpow2.f32 %v353_v42 }
 0x362   :  { %v738_v44 = vpop.eup %737 }
 0x363   :  { %356 = vrot.lane.b32.xlu1 %v738_v44, %s749_s16 }
 0x3c3   :  { %v348_v46 = vpop.permute.xlu0 %347 }
 0x3c4   :  { %351 = vst.msk [vmem:[%s916_s2] sm:$0xff] %vm350_vm5, %v348_v46 }
 0x3d5   :  { %v357_v47 = vpop.permute.xlu1 %356 }
 0x3d6   :  { %v359_v48 = vmul.f32 %v357_v47, %v770_v0  ;;  %v533_v0 = vld [vmem:[%s915_s1 + $0x98] sm:$0xff] }
 0x3d8   :  { %361 = vrot.lane.b32.xlu1 %v359_v48, %s750_s18 }
 0x3dc   :  { %536 = vrot.lane.b32.xlu1 %v804_v9, %s751_s19  ;;  %v614_v9 = vsub.s32 5, %v825_v17 }
 0x3de   :  { %v615_v10 = vrot.slane %v831_v19, %v614_v9 }
 0x44a   :  { %v362_v49 = vpop.permute.xlu1 %361 }
 0x44b   :  { %v364_v50 = vadd.f32 %v362_v49, %v343_v39 }
 0x44d   :  { %700 = vmatmul.mubr.msk.f32.vlgmr.msra.gmra.mxu1 %vm370_vm6, %v364_v50 }
 0x44e   :  { %721 = vmatprep.mubr.msk.f32.mxu1 %vm745_vm1, %v743_v1  ;;  %714 = vmatpush3.msra.mxu1 %v535_v62  ;;  %v537_v11 = vpop.permute.xlu1 %536 }
 0x44f   :  { %715 = vmatprep.subr.mxu1 %v743_v1 }
 0x450   :  { %716 = vmatpush3.msra.mxu1 %v534_v63 }
 0x451   :  { %717 = vmatprep.subr.mxu1 %v743_v1 }
 0x452   :  { %718 = vmatpush3.msra.mxu1 %v533_v0 }
 0x453   :  { %719 = vmatprep.subr.mxu1 %v743_v1 }
 0x454   :  { %720 = vmatpush3.msra.mxu1 %v532_v2 }
 0x50d   :  { %v440_v57 = vpop.f32.mrf.mxu1 }
 0x50e   :  { %v441_v58 = vadd.f32 %v440_v57, %v368_v45 }
 0x50f   :  { %v701_v59 = vpop.f32.mrf.mxu1 }
 0x510   :  { %v448_v60 = vadd.f32 %v447_v56, %v441_v58 }
 0x512   :  { %739 = vtanh.f32 %v448_v60 }
 0x51f   :  { %v740_v61 = vpop.eup %739 }
 0x520   :  { %711 = vmatmul.mubr.msk.f32.vlgmr.msra.gmra.mxu0 %vm190_vm4, %v740_v61 }
 0x5e0   :  { %v527_v5 = vpop.f32.mrf.mxu0 }
 0x5e1   :  { %v528_v6 = vadd.f32 %v527_v5, %v457_v4 }
 0x5e2   :  { %v712_v7 = vpop.f32.mrf.mxu0 }
 0x5e3   :  { %741 = vtanh.f32 %v528_v6 }
 0x5f0   :  { %v742_v8 = vpop.eup %741 }
 0x5f1   :  { %722 = vmatmul.mubr.msk.f32.vlgmr.msra.gmra.mxu1 %vm190_vm4, %v742_v8 }
 0x6b1   :  { %v608_v12 = vpop.f32.mrf.mxu1 }
 0x6b2   :  { %v609_v13 = vadd.f32 %v608_v12, %v537_v11 }
 0x6b3   :  { %v723_v1 = vpop.f32.mrf.mxu1 }
 0x6b4   :  { %v616_v14 = vadd.f32 %v615_v10, %v609_v13 }
 0x6b6   :  { %617 = vst.msk [vmem:[%s916_s2] sm:$0xff] %vm21_vm2, %v616_v14 }

</bundles_post_ra>
